<compile_context>
chip_gen: v7x
topology: tpu7x:2x2x1
jax: 0.10.0
libtpu: 0.0.40
codegen_flags: <defaults>
</compile_context>

<pallas_src>
import functools

import jax
import jax.numpy as jnp
from jax.experimental import pallas as pl
from jax.experimental.pallas import tpu as pltpu

N_IN = 64
N_HID = 64
N_OUT = 10
N_OUT_PAD = 128  # lane-dense padded output width


def _round_up(x, m):
    return ((x + m - 1) // m) * m


def mlp_kernel(x_ref, w1_ref, b1_ref, w2_ref, b2_ref, w3_ref, b3_ref, o_ref):
    # One batch tile: (TB, 64) -> (TB, 128).  Matmuls hit the MXU with f32
    # accumulation; ReLUs run on the VPU; everything stays in vregs/VMEM.
    x = x_ref[...]
    h1 = jnp.dot(x, w1_ref[...], preferred_element_type=jnp.float32) + b1_ref[...]
    h1 = jnp.maximum(h1, 0.0)
    h2 = (
        jnp.dot(h1.astype(w2_ref.dtype), w2_ref[...], preferred_element_type=jnp.float32)
        + b2_ref[...]
    )
    h2 = jnp.maximum(h2, 0.0)
    out = (
        jnp.dot(h2.astype(w3_ref.dtype), w3_ref[...], preferred_element_type=jnp.float32)
        + b3_ref[...]
    )
    o_ref[...] = out.astype(o_ref.dtype)


@functools.partial(jax.jit, static_argnames=("block_b", "compute_dtype"))
def mlp_forward(x, params, *, block_b=512, compute_dtype=jnp.float32):
    w1, b1, w2, b2, w3, b3 = params
    B, _ = x.shape

    # Batch tile: big enough to amortize per-step overhead / fill the MXU,
    # but never larger than the (8-row aligned) batch itself.
    TB = min(block_b, _round_up(B, 8))
    Bp = _round_up(B, TB)
    if Bp != B:
        x = jnp.pad(x, ((0, Bp - B), (0, 0)))

    # Lane-dense last layer: pad (64, 10)/(1, 10) -> (64, 128)/(1, 128).
    w3p = jnp.pad(w3, ((0, 0), (0, N_OUT_PAD - N_OUT)))
    b3p = jnp.pad(b3, ((0, 0), (0, N_OUT_PAD - N_OUT)))

    # Optional bf16 compute path for v6e/v7x (biases / accumulation stay f32).
    x = x.astype(compute_dtype)
    w1c, w2c, w3c = (w.astype(compute_dtype) for w in (w1, w2, w3p))

    grid = (Bp // TB,)

    flops = 2 * Bp * (N_IN * N_HID + N_HID * N_HID + N_HID * N_OUT_PAD)
    bytes_accessed = (
        Bp * N_IN * x.dtype.itemsize
        + (N_IN * N_HID + N_HID * N_HID + N_HID * N_OUT_PAD) * w1c.dtype.itemsize
        + (N_HID + N_HID + N_OUT_PAD) * 4
        + Bp * N_OUT_PAD * 4
    )

    out = pl.pallas_call(
        mlp_kernel,
        out_shape=jax.ShapeDtypeStruct((Bp, N_OUT_PAD), jnp.float32),
        grid=grid,
        in_specs=[
            pl.BlockSpec((TB, N_IN), lambda i: (i, 0)),          # x: blocked over batch
            pl.BlockSpec((N_IN, N_HID), lambda i: (0, 0)),       # w1: grid-invariant (VMEM-resident)
            pl.BlockSpec((1, N_HID), lambda i: (0, 0)),          # b1
            pl.BlockSpec((N_HID, N_HID), lambda i: (0, 0)),      # w2
            pl.BlockSpec((1, N_HID), lambda i: (0, 0)),          # b2
            pl.BlockSpec((N_HID, N_OUT_PAD), lambda i: (0, 0)),  # w3 (lane-padded)
            pl.BlockSpec((1, N_OUT_PAD), lambda i: (0, 0)),      # b3 (lane-padded)
        ],
        out_specs=pl.BlockSpec((TB, N_OUT_PAD), lambda i: (i, 0)),
        compiler_params=pltpu.CompilerParams(
            dimension_semantics=("parallel",),
        ),
        cost_estimate=pl.CostEstimate(
            flops=flops, transcendentals=0, bytes_accessed=bytes_accessed
        ),
    )(x, w1c, b1, w2c, b2, w3c, b3p)

    # Strip batch padding and the lane padding of the final layer.
    return out[:B, :N_OUT]


def init_params(key):
    """Deterministic parameter init matching nn.Linear shapes.

    PyTorch stores weight as (out, in); we generate the transposed (in, out)
    layout directly so the kernel can do x @ W + b.  Uses the same
    U(-1/sqrt(fan_in), 1/sqrt(fan_in)) range as torch's default init.
    """
    ks = jax.random.split(key, 6)

    def lin(kw, kb, fan_in, fan_out):
        bound = 1.0 / jnp.sqrt(fan_in)
        w = jax.random.uniform(kw, (fan_in, fan_out), jnp.float32, -bound, bound)
        # biases kept 2-D (1, fan_out) so they broadcast cleanly across TPU lanes
        b = jax.random.uniform(kb, (1, fan_out), jnp.float32, -bound, bound)
        return w, b

    w1, b1 = lin(ks[0], ks[1], N_IN, N_HID)
    w2, b2 = lin(ks[2], ks[3], N_HID, N_HID)
    w3, b3 = lin(ks[4], ks[5], N_HID, N_OUT)
    return (w1, b1, w2, b2, w3, b3)


def mlp_reference(x, params):
    w1, b1, w2, b2, w3, b3 = params
    h1 = jnp.maximum(x @ w1 + b1, 0.0)
    h2 = jnp.maximum(h1 @ w2 + b2, 0.0)
    return h2 @ w3 + b3


if __name__ == "__main__":
    key = jax.random.PRNGKey(0)
    kx, kp = jax.random.split(key)

    # Batch that is not a multiple of the tile, to exercise grid + padding.
    B = 200
    x = jax.random.normal(kx, (B, N_IN), jnp.float32)
    params = init_params(kp)

    # Small block_b so the test runs a multi-step grid (4 tiles of 64 rows);
    # production callers leave the default 512 (or use larger batches).
    out = mlp_forward(x, params, block_b=64)
    out = jax.block_until_ready(out)

    ref = mlp_reference(x, params)
    assert out.shape == (B, N_OUT), out.shape
    assert jnp.allclose(out, ref, atol=1e-5, rtol=1e-5), "mismatch vs reference"

    # Also exercise the default (single-tile) path at a small batch.
    out2 = jax.block_until_ready(mlp_forward(x[:32], params))
    assert jnp.allclose(out2, mlp_reference(x[:32], params), atol=1e-5, rtol=1e-5)

    print("KERNEL_OK")
</pallas_src>

<mosaic_0001>
module attributes {stable_mosaic.version = 11 : i64} {
  func.func @mlp_kernel(%arg0: i32, %arg1: memref<64x64xf32, #tpu.memory_space<vmem>>, %arg2: memref<64x64xf32, #tpu.memory_space<vmem>>, %arg3: memref<1x64xf32, #tpu.memory_space<vmem>>, %arg4: memref<64x64xf32, #tpu.memory_space<vmem>>, %arg5: memref<1x64xf32, #tpu.memory_space<vmem>>, %arg6: memref<64x128xf32, #tpu.memory_space<vmem>>, %arg7: memref<1x128xf32, #tpu.memory_space<vmem>>, %arg8: memref<64x128xf32, #tpu.memory_space<vmem>>) attributes {dimension_semantics = [#tpu.dimension_semantics<parallel>], iteration_bounds = array<i64: 4>, scalar_prefetch = 0 : i64, scratch_operands = 0 : i64, tpu.core_type = #tpu.core_type<tc>, window_params = [{transform_indices = @transform_0, window_bounds = array<i64: 64, 64>}, {pipeline_mode = #tpu.pipeline_mode<synchronous>, transform_indices = @transform_1, window_bounds = array<i64: 64, 64>}, {pipeline_mode = #tpu.pipeline_mode<synchronous>, transform_indices = @transform_2, window_bounds = array<i64: 1, 64>}, {pipeline_mode = #tpu.pipeline_mode<synchronous>, transform_indices = @transform_3, window_bounds = array<i64: 64, 64>}, {pipeline_mode = #tpu.pipeline_mode<synchronous>, transform_indices = @transform_4, window_bounds = array<i64: 1, 64>}, {pipeline_mode = #tpu.pipeline_mode<synchronous>, transform_indices = @transform_5, window_bounds = array<i64: 64, 128>}, {pipeline_mode = #tpu.pipeline_mode<synchronous>, transform_indices = @transform_6, window_bounds = array<i64: 1, 128>}, {transform_indices = @transform_7, window_bounds = array<i64: 64, 128>}]} {
    %c0 = arith.constant 0 : index
    %c0_0 = arith.constant 0 : index
    %0 = vector.load %arg1[%c0, %c0_0] : memref<64x64xf32, #tpu.memory_space<vmem>>, vector<64x64xf32>
    %c0_1 = arith.constant 0 : index
    %c0_2 = arith.constant 0 : index
    %1 = vector.load %arg2[%c0_1, %c0_2] : memref<64x64xf32, #tpu.memory_space<vmem>>, vector<64x64xf32>
    %cst = arith.constant dense<0.000000e+00> : vector<64x64xf32>
    %2 = tpu.matmul %0, %1, %cst {dimension_numbers = #tpu.dot_dimension_numbers<[1], [0], [0], [1], [0, 0, 1, 1], [], []>} : vector<64x64xf32>, vector<64x64xf32>, vector<64x64xf32> -> vector<64x64xf32>
    %c0_3 = arith.constant 0 : index
    %c0_4 = arith.constant 0 : index
    %3 = vector.load %arg3[%c0_3, %c0_4] : memref<1x64xf32, #tpu.memory_space<vmem>>, vector<1x64xf32>
    %4 = vector.broadcast %3 : vector<1x64xf32> to vector<64x64xf32>
    %5 = arith.addf %2, %4 : vector<64x64xf32>
    %cst_5 = arith.constant 0.000000e+00 : f32
    %6 = vector.broadcast %cst_5 : f32 to vector<64x64xf32>
    %7 = arith.maximumf %5, %6 : vector<64x64xf32>
    %c0_6 = arith.constant 0 : index
    %c0_7 = arith.constant 0 : index
    %8 = vector.load %arg4[%c0_6, %c0_7] : memref<64x64xf32, #tpu.memory_space<vmem>>, vector<64x64xf32>
    %cst_8 = arith.constant dense<0.000000e+00> : vector<64x64xf32>
    %9 = tpu.matmul %7, %8, %cst_8 {dimension_numbers = #tpu.dot_dimension_numbers<[1], [0], [0], [1], [0, 0, 1, 1], [], []>} : vector<64x64xf32>, vector<64x64xf32>, vector<64x64xf32> -> vector<64x64xf32>
    %c0_9 = arith.constant 0 : index
    %c0_10 = arith.constant 0 : index
    %10 = vector.load %arg5[%c0_9, %c0_10] : memref<1x64xf32, #tpu.memory_space<vmem>>, vector<1x64xf32>
    %11 = vector.broadcast %10 : vector<1x64xf32> to vector<64x64xf32>
    %12 = arith.addf %9, %11 : vector<64x64xf32>
    %cst_11 = arith.constant 0.000000e+00 : f32
    %13 = vector.broadcast %cst_11 : f32 to vector<64x64xf32>
    %14 = arith.maximumf %12, %13 : vector<64x64xf32>
    %c0_12 = arith.constant 0 : index
    %c0_13 = arith.constant 0 : index
    %15 = vector.load %arg6[%c0_12, %c0_13] : memref<64x128xf32, #tpu.memory_space<vmem>>, vector<64x128xf32>
    %cst_14 = arith.constant dense<0.000000e+00> : vector<64x128xf32>
    %16 = tpu.matmul %14, %15, %cst_14 {dimension_numbers = #tpu.dot_dimension_numbers<[1], [0], [0], [1], [0, 0, 1, 1], [], []>} : vector<64x64xf32>, vector<64x128xf32>, vector<64x128xf32> -> vector<64x128xf32>
    %c0_15 = arith.constant 0 : index
    %c0_16 = arith.constant 0 : index
    %17 = vector.load %arg7[%c0_15, %c0_16] : memref<1x128xf32, #tpu.memory_space<vmem>>, vector<1x128xf32>
    %18 = vector.broadcast %17 : vector<1x128xf32> to vector<64x128xf32>
    %19 = arith.addf %16, %18 : vector<64x128xf32>
    %c0_17 = arith.constant 0 : index
    %c0_18 = arith.constant 0 : index
    %20 = vector.load %arg8[%c0_17, %c0_18] : memref<64x128xf32, #tpu.memory_space<vmem>>, vector<64x128xf32>
    tpu.vector_store %arg8[%c0_17, %c0_18], %19 {strides = array<i32>} : memref<64x128xf32, #tpu.memory_space<vmem>>, vector<64x128xf32>,
    return
  }
  func.func @transform_0(%arg0: i32) -> (i32, i32) {
    %c0_i32 = arith.constant 0 : i32
    %c0_i32_0 = arith.constant 0 : i32
    return %arg0, %c0_i32 : i32, i32
  }
  func.func @transform_1(%arg0: i32) -> (i32, i32) {
    %c0_i32 = arith.constant 0 : i32
    %c0_i32_0 = arith.constant 0 : i32
    %c0_i32_1 = arith.constant 0 : i32
    return %c0_i32, %c0_i32_0 : i32, i32
  }
  func.func @transform_2(%arg0: i32) -> (i32, i32) {
    %c0_i32 = arith.constant 0 : i32
    %c0_i32_0 = arith.constant 0 : i32
    %c0_i32_1 = arith.constant 0 : i32
    return %c0_i32, %c0_i32_0 : i32, i32
  }
  func.func @transform_3(%arg0: i32) -> (i32, i32) {
    %c0_i32 = arith.constant 0 : i32
    %c0_i32_0 = arith.constant 0 : i32
    %c0_i32_1 = arith.constant 0 : i32
    return %c0_i32, %c0_i32_0 : i32, i32
  }
  func.func @transform_4(%arg0: i32) -> (i32, i32) {
    %c0_i32 = arith.constant 0 : i32
    %c0_i32_0 = arith.constant 0 : i32
    %c0_i32_1 = arith.constant 0 : i32
    return %c0_i32, %c0_i32_0 : i32, i32
  }
  func.func @transform_5(%arg0: i32) -> (i32, i32) {
    %c0_i32 = arith.constant 0 : i32
    %c0_i32_0 = arith.constant 0 : i32
    %c0_i32_1 = arith.constant 0 : i32
    return %c0_i32, %c0_i32_0 : i32, i32
  }
  func.func @transform_6(%arg0: i32) -> (i32, i32) {
    %c0_i32 = arith.constant 0 : i32
    %c0_i32_0 = arith.constant 0 : i32
    %c0_i32_1 = arith.constant 0 : i32
    return %c0_i32, %c0_i32_0 : i32, i32
  }
  func.func @transform_7(%arg0: i32) -> (i32, i32) {
    %c0_i32 = arith.constant 0 : i32
    %c0_i32_0 = arith.constant 0 : i32
    return %arg0, %c0_i32 : i32, i32
  }
}

</mosaic_0001>

<bundles_post_ra>
// kernel: mlp_forward.1
= control target key start
LH: loop header
LB: loop body
LE: loop exit
PB: predicated region body
PF: predicated region fallthrough
CT: control target
= control target key end

     0   :  { %s1085_s24 = smov 0   ;;  %s1214_s0 = inlined_call_operand.vmem [shape: f32[256,64], index: 0, kind: input, shape index: {}]   ;;  %s1215_s1 = inlined_call_operand.vmem [shape: f32[64,64], index: 1, kind: input, shape index: {}]   ;;  %s1216_s2 = inlined_call_operand.vmem [shape: f32[1,64], index: 2, kind: input, shape index: {}]   ;;  %s1217_s3 = inlined_call_operand.vmem [shape: f32[64,64], index: 3, kind: input, shape index: {}]   ;;  %s1218_s4 = inlined_call_operand.vmem [shape: f32[1,64], index: 4, kind: input, shape index: {}]   ;;  %s1219_s5 = inlined_call_operand.vmem [shape: f32[64,128], index: 5, kind: input, shape index: {}]   ;;  %s1220_s6 = inlined_call_operand.vmem [shape: f32[1,128], index: 6, kind: input, shape index: {}]   ;;  %s1221_s7 = inlined_call_operand.vmem [shape: f32[256,128], index: 7, kind: output, shape index: {}]  }
   0x1 LB: > { %s803_s25 = sadd.s32 4294967295, %s1043_s24   ;;  %p807_p0 = scmp.ge.s32.totalorder %s1043_s24, 1  ;;  %s1043_s24 = sphi %s1085_s24, %s17_s24  }
   0x2   : > { %p238_p1 = scmp.lt.s32.totalorder %s1043_s24, 5 }
   0x4   : > { %p239_p2 = pnand %p807_p0, %p238_p1 }
   0x5   : > { %v290_v0 = vld [vmem:[%s1215_s1] sm:$0xff] (!%p239_p2)  ;;  %v291_v1 = vld [vmem:[%s1215_s1 + $0x8] sm:$0xff] (!%p239_p2)  ;;  %v292_v2 = vld [vmem:[%s1215_s1 + $0x10] sm:$0xff] (!%p239_p2)  ;;  %s808_s9 = sshll.u32 (!%p239_p2), %s803_s25, 3  ;;  %vm305_vm0 = vcmask (!%p239_p2), 523264  }
   0x6   : > { %242 = sbr.rel (%p239_p2) target bundleno = 688 (0x2b0), region = 48  ;;  %v973_v3 = vpack.c.bf16 (!%p239_p2), %v291_v1, %v290_v0  ;;  %v293_v4 = vld [vmem:[%s1215_s1 + $0x18] sm:$0xff] (!%p239_p2)  ;;  %p271_p3 = scmp.lt.s32.totalorder (!%p239_p2), %s808_s9, 31  ;;  %v294_v6 = vld [vmem:[%s1215_s1 + $0x20] sm:$0xff] (!%p239_p2)  ;;  %v295_v7 = vld [vmem:[%s1215_s1 + $0x28] sm:$0xff] (!%p239_p2) }
   0x7   : > { %v977_v5 = vpack.c.bf16 (!%p239_p2), %v293_v4, %v292_v2  ;;  %v443_v8 = vld [vmem:[%s1217_s3] sm:$0xff] (!%p239_p2)  ;;  %v444_v9 = vld [vmem:[%s1217_s3 + $0x8] sm:$0xff] (!%p239_p2)  ;;  %v445_v10 = vld [vmem:[%s1217_s3 + $0x10] sm:$0xff] (!%p239_p2)  ;;  %v981_v13 = vpack.c.bf16 (!%p239_p2), %v295_v7, %v294_v6 }
   0x8   : > { %974 = vmatprep.subr.bf16.mxu0 (!%p239_p2), %v973_v3  ;;  %v446_v11 = vld [vmem:[%s1217_s3 + $0x18] sm:$0xff] (!%p239_p2)  ;;  %v989_v12 = vpack.c.bf16 (!%p239_p2), %v444_v9, %v443_v8  ;;  %v447_v15 = vld [vmem:[%s1217_s3 + $0x20] sm:$0xff] (!%p239_p2)  ;;  %v448_v16 = vld [vmem:[%s1217_s3 + $0x28] sm:$0xff] (!%p239_p2) }
   0x9   : > { %976 = vmatpush3.bf16.msra.mxu0 (!%p239_p2), %v973_v3  ;;  %v993_v14 = vpack.c.bf16 (!%p239_p2), %v446_v11, %v445_v10  ;;  %v296_v17 = vld [vmem:[%s1215_s1 + $0x30] sm:$0xff] (!%p239_p2)  ;;  %v297_v18 = vld [vmem:[%s1215_s1 + $0x38] sm:$0xff] (!%p239_p2)  ;;  %v997_v20 = vpack.c.bf16 (!%p239_p2), %v448_v16, %v447_v15  ;;  %v595_v32 = vld [vmem:[%s1219_s5] sm:$0xff] (!%p239_p2) }
   0xa   : > { %978 = vmatprep.subr.bf16.mxu0 (!%p239_p2), %v977_v5  ;;  %990 = vmatprep.subr.bf16.mxu1 (!%p239_p2), %v989_v12  ;;  %v985_v21 = vpack.c.bf16 (!%p239_p2), %v297_v18, %v296_v17  ;;  %v449_v29 = vld [vmem:[%s1217_s3 + $0x30] sm:$0xff] (!%p239_p2)  ;;  %v450_v30 = vld [vmem:[%s1217_s3 + $0x38] sm:$0xff] (!%p239_p2)  ;;  %v596_v33 = vld [vmem:[%s1219_s5 + $0x8] sm:$0xff] (!%p239_p2) }
   0xb   : > { %992 = vmatpush3.bf16.msra.mxu1 (!%p239_p2), %v989_v12  ;;  %v1001_v31 = vpack.c.bf16 (!%p239_p2), %v450_v30, %v449_v29  ;;  %v597_v34 = vld [vmem:[%s1219_s5 + $0x10] sm:$0xff] (!%p239_p2)  ;;  %v1005_v35 = vpack.c.bf16 (!%p239_p2), %v596_v33, %v595_v32  ;;  %v598_v36 = vld [vmem:[%s1219_s5 + $0x18] sm:$0xff] (!%p239_p2)  ;;  %v599_v38 = vld [vmem:[%s1219_s5 + $0x20] sm:$0xff] (!%p239_p2) }
   0xc   : > { %994 = vmatprep.subr.bf16.mxu1 (!%p239_p2), %v993_v14  ;;  %v1009_v37 = vpack.c.bf16 (!%p239_p2), %v598_v36, %v597_v34  ;;  %v600_v39 = vld [vmem:[%s1219_s5 + $0x28] sm:$0xff] (!%p239_p2)  ;;  %v812_v41 = vld [vmem:[%s1216_s2] ss:$0 sm:$0xff] (!%p239_p2)  ;;  %v601_v2 = vld [vmem:[%s1219_s5 + $0x30] sm:$0xff] (!%p239_p2) }
   0xd   : > { %s1223_s9 = smov (!%p271_p3, %s808_s9), 31  ;;  %980 = vmatpush3.bf16.msra.mxu0 %v977_v5  ;;  %v1013_v40 = vpack.c.bf16 %v600_v39, %v599_v38  ;;  %v602_v3 = vld [vmem:[%s1219_s5 + $0x38] sm:$0xff]  ;;  %v821_v5 = vld [vmem:[%s1218_s4] ss:$0 sm:$0xff] }
   0xe   : > { %s809_s25 = sshll.u32 %s1223_s9, 3  ;;  %982 = vmatprep.subr.bf16.mxu0 %v981_v13  ;;  %v1017_v4 = vpack.c.bf16 %v602_v3, %v601_v2  ;;  %v830_v30 = vld [vmem:[%s1220_s6] ss:$0 sm:$0xff] }
   0xf   : > { %s274_s14 = scalar_lea.vmem %s1214_s0, %s809_s25  ;;  %996 = vmatpush3.bf16.msra.mxu1 %v993_v14  ;;  %s280_s23 = scalar_lea.vmem %s1221_s7, %s809_s25 }
  0x10   : > { %v282_v19 = vld [vmem:[%s274_s14] sm:$0xff]  ;;  %998 = vmatprep.subr.bf16.mxu1 %v997_v20  ;;  %v283_v22 = vld [vmem:[%s274_s14 + $0x8] sm:$0xff]  ;;  %v284_v23 = vld [vmem:[%s274_s14 + $0x10] sm:$0xff] }
  0x11   : > { %905 = vmatprep.mubr.msk.f32.mxu0 %vm305_vm0, %v282_v19  ;;  %984 = vmatpush3.bf16.msra.mxu0 %v981_v13  ;;  %v285_v24 = vld [vmem:[%s274_s14 + $0x18] sm:$0xff]  ;;  %v286_v25 = vld [vmem:[%s274_s14 + $0x20] sm:$0xff]  ;;  %v287_v26 = vld [vmem:[%s274_s14 + $0x28] sm:$0xff] }
  0x12   : > { %986 = vmatprep.subr.bf16.mxu0 %v985_v21  ;;  %v288_v27 = vld [vmem:[%s274_s14 + $0x30] sm:$0xff]  ;;  %v289_v28 = vld [vmem:[%s274_s14 + $0x38] sm:$0xff] }
  0x13   : > { %1000 = vmatpush3.bf16.msra.mxu1 %v997_v20 }
  0x14   : > { %1002 = vmatprep.subr.bf16.mxu1 %v1001_v31 }
  0x15   : > { %988 = vmatpush3.bf16.msra.mxu0 %v985_v21 }
  0x16   : > { %1006 = vmatprep.subr.bf16.mxu0 %v1005_v35 }
  0x17   : > { %1004 = vmatpush3.bf16.msra.mxu1 %v1001_v31 }
  0x18   : > { %906 = vmatmul.mubr.msk.f32.vlgmr.msra.gmra.mrb[0].mxu0 %vm305_vm0, %v283_v22  ;;  %1021 = vmatprep.subr.bf16.mxu1 %v1005_v35 }
  0x19   : > { %908 = vmatprep.mubr.msk.f32.mxu0 %vm305_vm0, %v284_v23  ;;  %1008 = vmatpush3.bf16.msra.mxu0 %v1005_v35 }
  0x1a   : > { %1010 = vmatprep.subr.bf16.mxu0 %v1009_v37 }
  0x1c   : > { %909 = vmatmul.mubr.msk.f32.gmra.mrb[2].mxu0 %vm305_vm0, %v285_v24 }
  0x1d   : > { %911 = vmatprep.mubr.msk.f32.mxu0 %vm305_vm0, %v286_v25  ;;  %1012 = vmatpush3.bf16.msra.mxu0 %v1009_v37 }
  0x1e   : > { %1014 = vmatprep.subr.bf16.mxu0 %v1013_v40 }
  0x20   : > { %912 = vmatmul.mubr.msk.f32.gmra.mrb[4].mxu0 %vm305_vm0, %v287_v26 }
  0x21   : > { %914 = vmatprep.mubr.msk.f32.mxu0 %vm305_vm0, %v288_v27  ;;  %1016 = vmatpush3.bf16.msra.mxu0 %v1013_v40 }
  0x22   : > { %1018 = vmatprep.subr.bf16.mxu0 %v1017_v4 }
  0x24   : > { %915 = vmatmul.mubr.msk.f32.gmra.mrb[6].mxu0 %vm305_vm0, %v289_v28 }
  0x25   : > { %1020 = vmatpush3.bf16.msra.mxu0 %v1017_v4 }
  0xeb   : > { %v907_v42 = vpop.f32.mrb[0].mxu0 }
  0xec   : > { %v402_v43 = vadd.f32 %v907_v42, %v812_v41  ;;  %v396_v44 = vpop.f32.mrb[1].mxu0 }
  0xed   : > { %v397_v45 = vadd.f32 %v812_v41, %v396_v44 }
  0xee   : > { %v436_v48 = vmax.f32 %v402_v43, 0.0 }
  0xef   : > { %v435_v46 = vmax.f32 %v397_v45, 0.0  ;;  %v910_v47 = vpop.f32.mrb[2].mxu0 }
  0xf0   : > { %v412_v49 = vadd.f32 %v910_v47, %v812_v41  ;;  %v406_v50 = vpop.f32.mrb[3].mxu0 }
  0xf1   : > { %v407_v51 = vadd.f32 %v812_v41, %v406_v50  ;;  %933 = vmatprep.mubr.msk.f32.mxu1 %vm305_vm0, %v435_v46 }
  0xf2   : > { %934 = vmatmul.mubr.msk.f32.vlgmr.msra.gmra.mrb[0].mxu1 %vm305_vm0, %v436_v48  ;;  %v438_v54 = vmax.f32 %v412_v49, 0.0 }
  0xf3   : > { %v437_v52 = vmax.f32 %v407_v51, 0.0  ;;  %v913_v53 = vpop.f32.mrb[4].mxu0  ;;  %1025 = vmatpush3.bf16.msra.mxu1 %v1005_v35 }
  0xf4   : > { %v422_v55 = vadd.f32 %v913_v53, %v812_v41  ;;  %v416_v56 = vpop.f32.mrb[5].mxu0  ;;  %1022 = vmatprep.subr.bf16.mxu1 %v1009_v37 }
  0xf5   : > { %v417_v57 = vadd.f32 %v812_v41, %v416_v56  ;;  %936 = vmatprep.mubr.msk.f32.mxu1 %vm305_vm0, %v437_v52 }
  0xf6   : > { %937 = vmatmul.mubr.msk.f32.gmra.mrb[2].mxu1 %vm305_vm0, %v438_v54  ;;  %v440_v60 = vmax.f32 %v422_v55, 0.0 }
  0xf7   : > { %v439_v58 = vmax.f32 %v417_v57, 0.0  ;;  %v916_v59 = vpop.f32.mrb[6].mxu0  ;;  %1026 = vmatpush3.bf16.msra.mxu1 %v1009_v37 }
  0xf8   : > { %v432_v61 = vadd.f32 %v916_v59, %v812_v41  ;;  %v426_v62 = vpop.f32.mrb[7].mxu0  ;;  %1023 = vmatprep.subr.bf16.mxu1 %v1013_v40 }
  0xf9   : > { %v427_v63 = vadd.f32 %v812_v41, %v426_v62  ;;  %939 = vmatprep.mubr.msk.f32.mxu1 %vm305_vm0, %v439_v58 }
  0xfa   : > { %940 = vmatmul.mubr.msk.f32.gmra.mrb[4].mxu1 %vm305_vm0, %v440_v60  ;;  %v442_v1 = vmax.f32 %v432_v61, 0.0 }
  0xfb   : > { %v441_v0 = vmax.f32 %v427_v63, 0.0  ;;  %1027 = vmatpush3.bf16.msra.mxu1 %v1013_v40 }
  0xfc   : > { %1024 = vmatprep.subr.bf16.mxu1 %v1017_v4 }
  0xfd   : > { %942 = vmatprep.mubr.msk.f32.mxu1 %vm305_vm0, %v441_v0 }
  0xfe   : > { %943 = vmatmul.mubr.msk.f32.gmra.mrb[6].mxu1 %vm305_vm0, %v442_v1 }
  0xff   : > { %1028 = vmatpush3.bf16.msra.mxu1 %v1017_v4 }
 0x1c5   : > { %v935_v6 = vpop.f32.mrb[0].mxu1 }
 0x1c6   : > { %v554_v7 = vadd.f32 %v935_v6, %v821_v5  ;;  %v548_v8 = vpop.f32.mrb[1].mxu1 }
 0x1c7   : > { %v549_v9 = vadd.f32 %v821_v5, %v548_v8 }
 0x1c8   : > { %v588_v12 = vmax.f32 %v554_v7, 0.0 }
 0x1c9   : > { %v587_v10 = vmax.f32 %v549_v9, 0.0  ;;  %v938_v11 = vpop.f32.mrb[2].mxu1 }
 0x1ca   : > { %v564_v13 = vadd.f32 %v938_v11, %v821_v5  ;;  %v558_v14 = vpop.f32.mrb[3].mxu1 }
 0x1cb   : > { %v559_v15 = vadd.f32 %v821_v5, %v558_v14  ;;  %961 = vmatprep.mubr.msk.f32.mxu0 %vm305_vm0, %v587_v10 }
 0x1cc   : > { %962 = vmatmul.mubr.msk.f32.vlgmr.msra.gmra.mrb[8].mxu0 %vm305_vm0, %v588_v12  ;;  %v590_v18 = vmax.f32 %v564_v13, 0.0 }
 0x1cd   : > { %v589_v16 = vmax.f32 %v559_v15, 0.0  ;;  %v941_v17 = vpop.f32.mrb[4].mxu1 }
 0x1ce   : > { %v574_v19 = vadd.f32 %v941_v17, %v821_v5  ;;  %v568_v20 = vpop.f32.mrb[5].mxu1 }
 0x1cf   : > { %v569_v21 = vadd.f32 %v821_v5, %v568_v20  ;;  %964 = vmatprep.mubr.msk.f32.mxu0 %vm305_vm0, %v589_v16 }
 0x1d0   : > { %965 = vmatmul.mubr.msk.f32.gmra.mrb[10].mxu0 %vm305_vm0, %v590_v18  ;;  %v592_v24 = vmax.f32 %v574_v19, 0.0 }
 0x1d1   : > { %v591_v22 = vmax.f32 %v569_v21, 0.0  ;;  %v944_v23 = vpop.f32.mrb[6].mxu1 }
 0x1d2   : > { %v584_v25 = vadd.f32 %v944_v23, %v821_v5  ;;  %v578_v26 = vpop.f32.mrb[7].mxu1 }
 0x1d3   : > { %v579_v27 = vadd.f32 %v821_v5, %v578_v26  ;;  %967 = vmatprep.mubr.msk.f32.mxu1 %vm305_vm0, %v591_v22 }
 0x1d4   : > { %968 = vmatmul.mubr.msk.f32.vlgmr.msra.gmra.mrb[8].mxu1 %vm305_vm0, %v592_v24  ;;  %v594_v29 = vmax.f32 %v584_v25, 0.0 }
 0x1d5   : > { %v593_v28 = vmax.f32 %v579_v27, 0.0 }
 0x1d7   : > { %970 = vmatprep.mubr.msk.f32.mxu1 %vm305_vm0, %v593_v28 }
 0x1d8   : > { %971 = vmatmul.mubr.msk.f32.gmra.mrb[10].mxu1 %vm305_vm0, %v594_v29 }
 0x29f   : > { %v963_v31 = vpop.f32.mrb[8].mxu0 }
 0x2a0   : > { %v706_v32 = vadd.f32 %v963_v31, %v830_v30  ;;  %v700_v33 = vpop.f32.mrb[9].mxu0 }
 0x2a1   : > { %v701_v34 = vadd.f32 %v830_v30, %v700_v33 }
 0x2a2   : > { %740 = vst [vmem:[%s280_s23 + $0x8] sm:$0xff] %v706_v32 }
 0x2a3   : > { %739 = vst [vmem:[%s280_s23] sm:$0xff] %v701_v34  ;;  %v966_v35 = vpop.f32.mrb[10].mxu0 }
 0x2a4   : > { %v716_v36 = vadd.f32 %v966_v35, %v830_v30  ;;  %v710_v37 = vpop.f32.mrb[11].mxu0 }
 0x2a5   : > { %v711_v38 = vadd.f32 %v830_v30, %v710_v37 }
 0x2a6   : > { %742 = vst [vmem:[%s280_s23 + $0x18] sm:$0xff] %v716_v36 }
 0x2a7   : > { %741 = vst [vmem:[%s280_s23 + $0x10] sm:$0xff] %v711_v38  ;;  %v969_v39 = vpop.f32.mrb[8].mxu1 }
 0x2a8   : > { %v726_v40 = vadd.f32 %v969_v39, %v830_v30  ;;  %v720_v41 = vpop.f32.mrb[9].mxu1 }
 0x2a9   : > { %v721_v42 = vadd.f32 %v830_v30, %v720_v41 }
 0x2aa   : > { %744 = vst [vmem:[%s280_s23 + $0x28] sm:$0xff] %v726_v40 }
 0x2ab   : > { %743 = vst [vmem:[%s280_s23 + $0x20] sm:$0xff] %v721_v42  ;;  %v972_v43 = vpop.f32.mrb[10].mxu1 }
 0x2ac   : > { %v736_v44 = vadd.f32 %v972_v43, %v830_v30  ;;  %v730_v45 = vpop.f32.mrb[11].mxu1 }
 0x2ad   : > { %v731_v46 = vadd.f32 %v830_v30, %v730_v45 }
 0x2ae   : > { %746 = vst [vmem:[%s280_s23 + $0x38] sm:$0xff] %v736_v44 }
 0x2af   : > { %745 = vst [vmem:[%s280_s23 + $0x30] sm:$0xff] %v731_v46 }
 0x2b0 PF: > { %s17_s24 = sadd.s32 1, %s1043_s24  }
 0x2b1   : > { %p14_p4 = scmp.ge.s32.totalorder %s17_s24, 6  }
 0x2b3   :  { %16 = sbr.rel (!%p14_p4) target bundleno = 1 (0x1), region = 78 }

</bundles_post_ra>
